<compile_context>
chip_gen: v5e
topology: v5e:2x2
jax: 0.10.0
libtpu: 0.0.40
codegen_flags: <defaults>
</compile_context>

<pallas_src>
import jax
import jax.numpy as jnp
from jax.experimental import pallas as pl
from jax.experimental.pallas import tpu as pltpu

THETA_DIM = 4        # D
X_DIM = 8            # L
HIDDEN = 64          # zuko/lampe MLP default hidden_features = (64, 64)
SINGLE_TILE_MAX = 2048   # up to this batch: one tile, zero padding
TB_MAX = 4096            # per-step batch tile cap for large batches


def _round_up(n, m):
    return ((n + m - 1) // m) * m


def _pick_tiling(batch):
    """Return (TB, Bp, steps).

    Small/medium batch: one grid step whose block equals the full batch extent
    (legal for any TB because block dims equal to full array dims are exempt
    from the 8/128 divisibility rule) -> no padding, no pad copy.

    Large batch: >=2 grid steps (megacore on v7x), TB multiple of 128 (needed
    by the lane-dense (1, TB) output block), TB <= TB_MAX, tail padding <
    steps*128 rows.
    """
    if batch <= SINGLE_TILE_MAX:
        return batch, batch, 1
    steps = max(2, -(-batch // TB_MAX))
    tb = _round_up(-(-batch // steps), 128)
    bp = steps * tb
    return tb, bp, steps


def _nre_mlp_kernel(theta_ref, x_ref, w1t_ref, w1x_ref, b1_ref,
                    w2_ref, b2_ref, w3_ref, b3_ref, o_ref):
    """Fused 3-layer MLP on one batch tile.

    theta_ref: (TB, D) bf16, x_ref: (TB, L) bf16,
    w1t_ref: (D, H), w1x_ref: (L, H), w2_ref: (H, H), w3_ref: (1, H)  [bf16]
    b1/b2: (1, H) f32, b3: (1, 1) f32, o_ref: (1, TB) lane-dense f32 output.
    """
    compute_dtype = w2_ref.dtype

    # Layer 1 with the concat fused away:  z @ W1 == theta @ W1[:D] + x @ W1[D:]
    h1 = (jnp.dot(theta_ref[...], w1t_ref[...],
                  preferred_element_type=jnp.float32)
          + jnp.dot(x_ref[...], w1x_ref[...],
                    preferred_element_type=jnp.float32)
          + b1_ref[...])
    h1 = jnp.maximum(h1, 0.0).astype(compute_dtype)        # f32 ReLU, bf16 feed

    # Layer 2.
    h2 = jnp.dot(h1, w2_ref[...],
                 preferred_element_type=jnp.float32) + b2_ref[...]
    h2 = jnp.maximum(h2, 0.0).astype(compute_dtype)

    # Layer 3 (H -> 1): contract w3 (1, H) against h2 (TB, H) on the hidden
    # axis (q·k^T pattern) so the result is a lane-dense (1, TB) row and the
    # store is an unmasked vst.
    out = jax.lax.dot_general(
        w3_ref[...], h2,
        dimension_numbers=(((1,), (1,)), ((), ())),
        preferred_element_type=jnp.float32,
    ) + b3_ref[...]                                         # (1, TB)

    o_ref[...] = out.astype(o_ref.dtype)


@jax.jit
def _nre_mlp_pallas(theta, x, w1t, w1x, b1, w2, b2, w3, b3):
    """theta: (B, D), x: (B, L) -> (B,) float32 log-ratios."""
    B, D = theta.shape
    _, L = x.shape
    H = w2.shape[0]

    TB, Bp, steps = _pick_tiling(B)
    if Bp != B:
        # Only the large-batch ragged tail pads (<= steps*128 rows); the
        # common single-tile path never pads and never copies.
        theta = jnp.pad(theta, ((0, Bp - B), (0, 0)))
        x = jnp.pad(x, ((0, Bp - B), (0, 0)))

    in_bytes = theta.dtype.itemsize
    w_bytes = w2.dtype.itemsize
    cost = pl.CostEstimate(
        flops=2 * Bp * H * (D + L + H + 1),
        transcendentals=0,
        bytes_accessed=(Bp * (D + L) * in_bytes          # streamed inputs
                        + Bp * 4                         # f32 output row
                        + ((D + L) * H + H * H + H) * w_bytes),
    )

    out = pl.pallas_call(
        _nre_mlp_kernel,
        out_shape=jax.ShapeDtypeStruct((1, Bp), jnp.float32),
        grid_spec=pltpu.PrefetchScalarGridSpec(
            num_scalar_prefetch=0,
            grid=(steps,),
            in_specs=[
                pl.BlockSpec((TB, D), lambda i: (i, 0)),     # theta tile
                pl.BlockSpec((TB, L), lambda i: (i, 0)),     # x tile
                pl.BlockSpec((D, H), lambda i: (0, 0)),      # W1[:D]  (resident)
                pl.BlockSpec((L, H), lambda i: (0, 0)),      # W1[D:]  (resident)
                pl.BlockSpec((1, H), lambda i: (0, 0)),      # b1
                pl.BlockSpec((H, H), lambda i: (0, 0)),      # W2
                pl.BlockSpec((1, H), lambda i: (0, 0)),      # b2
                pl.BlockSpec((1, H), lambda i: (0, 0)),      # W3 row
                pl.BlockSpec((1, 1), lambda i: (0, 0)),      # b3
            ],
            # Lane-dense output: one (1, TB) row per grid step.
            out_specs=pl.BlockSpec((1, TB), lambda i: (0, i)),
        ),
        compiler_params=pltpu.CompilerParams(
            dimension_semantics=("parallel",),
            vmem_limit_bytes=32 * 1024 * 1024,   # raise v5e's 16 MiB default
        ),
        cost_estimate=cost,
    )(theta, x, w1t, w1x, b1, w2, b2, w3, b3)

    return out[0, :B]


def init_nre_params(key, theta_dim=THETA_DIM, x_dim=X_DIM, hidden=HIDDEN,
                    dtype=jnp.bfloat16):
    """Deterministic synthetic parameters for MLP(D+L -> H -> H -> 1).

    Matmul weights are stored in `dtype` (bf16 by default) for the MXU path;
    biases stay f32 (the bias+ReLU is done in f32 inside the kernel).
    """
    fin = theta_dim + x_dim
    k1, k2, k3 = jax.random.split(key, 3)

    def linear(k, n_in, n_out):
        kw, kb = jax.random.split(k)
        bound = 1.0 / jnp.sqrt(n_in)  # match nn.Linear's init scale
        w = jax.random.uniform(kw, (n_in, n_out), jnp.float32, -bound, bound)
        b = jax.random.uniform(kb, (1, n_out), jnp.float32, -bound, bound)
        return w, b

    w1, b1 = linear(k1, fin, hidden)
    w2, b2 = linear(k2, hidden, hidden)
    w3_col, b3 = linear(k3, hidden, 1)
    return dict(
        w1_theta=w1[:theta_dim].astype(dtype),   # (D, H) split -> no in-kernel
        w1_x=w1[theta_dim:].astype(dtype),       # (L, H)   sublane-crossing slice
        b1=b1,                                   # (1, H) f32
        w2=w2.astype(dtype),                     # (H, H)
        b2=b2,                                   # (1, H) f32
        w3=w3_col.T.astype(dtype),               # (1, H) row
        b3=b3,                                   # (1, 1) f32
    )


def nre_forward(params, theta, x, moments=None):
    """NRE.forward: theta (*, D), x (*, L) -> log-ratio (*,)."""
    compute_dtype = params["w2"].dtype

    # standardize: Identity when moments is None, else Affine(-mu/sigma, 1/sigma)
    if moments is not None:
        mu, sigma = moments
        theta = (theta - mu) / sigma

    # broadcast(theta, x, ignore=1): broadcast batch dims, keep last dims as-is.
    batch_shape = jnp.broadcast_shapes(theta.shape[:-1], x.shape[:-1])
    theta_b = jnp.broadcast_to(theta, batch_shape + theta.shape[-1:])
    x_b = jnp.broadcast_to(x, batch_shape + x.shape[-1:])

    theta2 = theta_b.reshape(-1, theta.shape[-1]).astype(compute_dtype)  # (B, D)
    x2 = x_b.reshape(-1, x.shape[-1]).astype(compute_dtype)              # (B, L)

    out = _nre_mlp_pallas(
        theta2, x2,
        params["w1_theta"], params["w1_x"], params["b1"],
        params["w2"], params["b2"],
        params["w3"], params["b3"],
    )                                                                    # (B,)
    return out.reshape(batch_shape)


def _reference_forward(params, theta, x, moments=None):
    """Pure-JAX reference (bf16-rounded inputs/weights, f32 math)."""
    compute_dtype = params["w2"].dtype
    if moments is not None:
        mu, sigma = moments
        theta = (theta - mu) / sigma
    batch_shape = jnp.broadcast_shapes(theta.shape[:-1], x.shape[:-1])
    theta_b = jnp.broadcast_to(theta, batch_shape + theta.shape[-1:])
    x_b = jnp.broadcast_to(x, batch_shape + x.shape[-1:])
    z = jnp.concatenate(
        [theta_b.astype(compute_dtype), x_b.astype(compute_dtype)], axis=-1
    ).reshape(-1, theta.shape[-1] + x.shape[-1]).astype(jnp.float32)
    w1 = jnp.concatenate([params["w1_theta"], params["w1_x"]],
                         axis=0).astype(jnp.float32)
    w2 = params["w2"].astype(jnp.float32)
    w3 = params["w3"].astype(jnp.float32)
    h1 = jnp.maximum(z @ w1 + params["b1"], 0.0)
    h1 = h1.astype(compute_dtype).astype(jnp.float32)
    h2 = jnp.maximum(h1 @ w2 + params["b2"], 0.0)
    h2 = h2.astype(compute_dtype).astype(jnp.float32)
    o = h2 @ w3.T + params["b3"]                           # (B, 1)
    return o[:, 0].reshape(batch_shape)


if __name__ == "__main__":
    key = jax.random.PRNGKey(0)
    kp, kt, kx = jax.random.split(key, 3)

    params = init_nre_params(kp)

    # Primary small check: batch = 8 (single tile, no padding).
    batch = 8
    theta = jax.random.normal(kt, (batch, THETA_DIM), jnp.float32)
    x = jax.random.normal(kx, (batch, X_DIM), jnp.float32)

    log_ratio = jax.block_until_ready(nre_forward(params, theta, x))
    ref = _reference_forward(params, theta, x)
    assert log_ratio.shape == (batch,), log_ratio.shape
    assert jnp.allclose(log_ratio, ref, atol=2e-2, rtol=2e-2), (
        "Pallas output mismatch vs reference (batch=8)")

    # Second check: non-multiple-of-8 batch -> block equals full extent, no pad.
    batch2 = 10
    theta2 = jax.random.normal(kt, (batch2, THETA_DIM), jnp.float32)
    x2 = jax.random.normal(kx, (batch2, X_DIM), jnp.float32)
    log_ratio2 = jax.block_until_ready(nre_forward(params, theta2, x2))
    ref2 = _reference_forward(params, theta2, x2)
    assert log_ratio2.shape == (batch2,), log_ratio2.shape
    assert jnp.allclose(log_ratio2, ref2, atol=2e-2, rtol=2e-2), (
        "Pallas output mismatch vs reference (batch=10)")

    # Third check: broadcast over batch dims (theta (3,1,D) x x (1,5,L) -> (3,5)).
    theta3 = jax.random.normal(kt, (3, 1, THETA_DIM), jnp.float32)
    x3 = jax.random.normal(kx, (1, 5, X_DIM), jnp.float32)
    log_ratio3 = jax.block_until_ready(nre_forward(params, theta3, x3))
    ref3 = _reference_forward(params, theta3, x3)
    assert log_ratio3.shape == (3, 5), log_ratio3.shape
    assert jnp.allclose(log_ratio3, ref3, atol=2e-2, rtol=2e-2), (
        "Pallas output mismatch vs reference (broadcast batch)")

    print("KERNEL_OK")
</pallas_src>

<mosaic_0001>
module attributes {stable_mosaic.version = 11 : i64} {
  func.func @_nre_mlp_kernel(%arg0: i32, %arg1: memref<8x4xbf16, #tpu.memory_space<vmem>>, %arg2: memref<8x8xbf16, #tpu.memory_space<vmem>>, %arg3: memref<4x64xbf16, #tpu.memory_space<vmem>>, %arg4: memref<8x64xbf16, #tpu.memory_space<vmem>>, %arg5: memref<1x64xf32, #tpu.memory_space<vmem>>, %arg6: memref<64x64xbf16, #tpu.memory_space<vmem>>, %arg7: memref<1x64xf32, #tpu.memory_space<vmem>>, %arg8: memref<1x64xbf16, #tpu.memory_space<vmem>>, %arg9: memref<1x1xf32, #tpu.memory_space<vmem>>, %arg10: memref<1x8xf32, #tpu.memory_space<vmem>>) attributes {dimension_semantics = [#tpu.dimension_semantics<parallel>], iteration_bounds = array<i64: 1>, scalar_prefetch = 0 : i64, scratch_operands = 0 : i64, tpu.core_type = #tpu.core_type<tc>, window_params = [{transform_indices = @transform_0, window_bounds = array<i64: 8, 4>}, {transform_indices = @transform_1, window_bounds = array<i64: 8, 8>}, {pipeline_mode = #tpu.pipeline_mode<synchronous>, transform_indices = @transform_2, window_bounds = array<i64: 4, 64>}, {pipeline_mode = #tpu.pipeline_mode<synchronous>, transform_indices = @transform_3, window_bounds = array<i64: 8, 64>}, {pipeline_mode = #tpu.pipeline_mode<synchronous>, transform_indices = @transform_4, window_bounds = array<i64: 1, 64>}, {pipeline_mode = #tpu.pipeline_mode<synchronous>, transform_indices = @transform_5, window_bounds = array<i64: 64, 64>}, {pipeline_mode = #tpu.pipeline_mode<synchronous>, transform_indices = @transform_6, window_bounds = array<i64: 1, 64>}, {pipeline_mode = #tpu.pipeline_mode<synchronous>, transform_indices = @transform_7, window_bounds = array<i64: 1, 64>}, {pipeline_mode = #tpu.pipeline_mode<synchronous>, transform_indices = @transform_8, window_bounds = array<i64: 1, 1>}, {transform_indices = @transform_9, window_bounds = array<i64: 1, 8>}]} {
    %c0 = arith.constant 0 : index
    %c0_0 = arith.constant 0 : index
    %0 = vector.load %arg1[%c0, %c0_0] : memref<8x4xbf16, #tpu.memory_space<vmem>>, vector<8x4xbf16>
    %c0_1 = arith.constant 0 : index
    %c0_2 = arith.constant 0 : index
    %1 = vector.load %arg3[%c0_1, %c0_2] : memref<4x64xbf16, #tpu.memory_space<vmem>>, vector<4x64xbf16>
    %cst = arith.constant dense<0.000000e+00> : vector<8x64xf32>
    %2 = tpu.matmul %0, %1, %cst {dimension_numbers = #tpu.dot_dimension_numbers<[1], [0], [0], [1], [0, 0, 1, 1], [], []>} : vector<8x4xbf16>, vector<4x64xbf16>, vector<8x64xf32> -> vector<8x64xf32>
    %c0_3 = arith.constant 0 : index
    %c0_4 = arith.constant 0 : index
    %3 = vector.load %arg2[%c0_3, %c0_4] : memref<8x8xbf16, #tpu.memory_space<vmem>>, vector<8x8xbf16>
    %c0_5 = arith.constant 0 : index
    %c0_6 = arith.constant 0 : index
    %4 = vector.load %arg4[%c0_5, %c0_6] : memref<8x64xbf16, #tpu.memory_space<vmem>>, vector<8x64xbf16>
    %cst_7 = arith.constant dense<0.000000e+00> : vector<8x64xf32>
    %5 = tpu.matmul %3, %4, %cst_7 {dimension_numbers = #tpu.dot_dimension_numbers<[1], [0], [0], [1], [0, 0, 1, 1], [], []>} : vector<8x8xbf16>, vector<8x64xbf16>, vector<8x64xf32> -> vector<8x64xf32>
    %6 = arith.addf %2, %5 : vector<8x64xf32>
    %c0_8 = arith.constant 0 : index
    %c0_9 = arith.constant 0 : index
    %7 = vector.load %arg5[%c0_8, %c0_9] : memref<1x64xf32, #tpu.memory_space<vmem>>, vector<1x64xf32>
    %8 = vector.broadcast %7 : vector<1x64xf32> to vector<8x64xf32>
    %9 = arith.addf %6, %8 : vector<8x64xf32>
    %cst_10 = arith.constant 0.000000e+00 : f32
    %10 = vector.broadcast %cst_10 : f32 to vector<8x64xf32>
    %11 = arith.maximumf %9, %10 : vector<8x64xf32>
    %12 = arith.truncf %11 : vector<8x64xf32> to vector<8x64xbf16>
    %c0_11 = arith.constant 0 : index
    %c0_12 = arith.constant 0 : index
    %13 = vector.load %arg6[%c0_11, %c0_12] : memref<64x64xbf16, #tpu.memory_space<vmem>>, vector<64x64xbf16>
    %cst_13 = arith.constant dense<0.000000e+00> : vector<8x64xf32>
    %14 = tpu.matmul %12, %13, %cst_13 {dimension_numbers = #tpu.dot_dimension_numbers<[1], [0], [0], [1], [0, 0, 1, 1], [], []>} : vector<8x64xbf16>, vector<64x64xbf16>, vector<8x64xf32> -> vector<8x64xf32>
    %c0_14 = arith.constant 0 : index
    %c0_15 = arith.constant 0 : index
    %15 = vector.load %arg7[%c0_14, %c0_15] : memref<1x64xf32, #tpu.memory_space<vmem>>, vector<1x64xf32>
    %16 = vector.broadcast %15 : vector<1x64xf32> to vector<8x64xf32>
    %17 = arith.addf %14, %16 : vector<8x64xf32>
    %cst_16 = arith.constant 0.000000e+00 : f32
    %18 = vector.broadcast %cst_16 : f32 to vector<8x64xf32>
    %19 = arith.maximumf %17, %18 : vector<8x64xf32>
    %20 = arith.truncf %19 : vector<8x64xf32> to vector<8x64xbf16>
    %c0_17 = arith.constant 0 : index
    %c0_18 = arith.constant 0 : index
    %21 = vector.load %arg8[%c0_17, %c0_18] : memref<1x64xbf16, #tpu.memory_space<vmem>>, vector<1x64xbf16>
    %cst_19 = arith.constant dense<0.000000e+00> : vector<1x8xf32>
    %22 = tpu.matmul %21, %20, %cst_19 {dimension_numbers = #tpu.dot_dimension_numbers<[1], [1], [0], [0], [0, 0, 1, 0], [], []>} : vector<1x64xbf16>, vector<8x64xbf16>, vector<1x8xf32> -> vector<1x8xf32>
    %c0_20 = arith.constant 0 : index
    %c0_21 = arith.constant 0 : index
    %23 = vector.load %arg9[%c0_20, %c0_21] : memref<1x1xf32, #tpu.memory_space<vmem>>, vector<1x1xf32>
    %24 = vector.broadcast %23 : vector<1x1xf32> to vector<1x8xf32>
    %25 = arith.addf %22, %24 : vector<1x8xf32>
    %c0_22 = arith.constant 0 : index
    %c0_23 = arith.constant 0 : index
    %26 = vector.load %arg10[%c0_22, %c0_23] : memref<1x8xf32, #tpu.memory_space<vmem>>, vector<1x8xf32>
    tpu.vector_store %arg10[%c0_22, %c0_23], %25 {strides = array<i32>} : memref<1x8xf32, #tpu.memory_space<vmem>>, vector<1x8xf32>,
    return
  }
  func.func @transform_0(%arg0: i32) -> (i32, i32) {
    %c0_i32 = arith.constant 0 : i32
    %c0_i32_0 = arith.constant 0 : i32
    return %arg0, %c0_i32 : i32, i32
  }
  func.func @transform_1(%arg0: i32) -> (i32, i32) {
    %c0_i32 = arith.constant 0 : i32
    %c0_i32_0 = arith.constant 0 : i32
    return %arg0, %c0_i32 : i32, i32
  }
  func.func @transform_2(%arg0: i32) -> (i32, i32) {
    %c0_i32 = arith.constant 0 : i32
    %c0_i32_0 = arith.constant 0 : i32
    %c0_i32_1 = arith.constant 0 : i32
    return %c0_i32, %c0_i32_0 : i32, i32
  }
  func.func @transform_3(%arg0: i32) -> (i32, i32) {
    %c0_i32 = arith.constant 0 : i32
    %c0_i32_0 = arith.constant 0 : i32
    %c0_i32_1 = arith.constant 0 : i32
    return %c0_i32, %c0_i32_0 : i32, i32
  }
  func.func @transform_4(%arg0: i32) -> (i32, i32) {
    %c0_i32 = arith.constant 0 : i32
    %c0_i32_0 = arith.constant 0 : i32
    %c0_i32_1 = arith.constant 0 : i32
    return %c0_i32, %c0_i32_0 : i32, i32
  }
  func.func @transform_5(%arg0: i32) -> (i32, i32) {
    %c0_i32 = arith.constant 0 : i32
    %c0_i32_0 = arith.constant 0 : i32
    %c0_i32_1 = arith.constant 0 : i32
    return %c0_i32, %c0_i32_0 : i32, i32
  }
  func.func @transform_6(%arg0: i32) -> (i32, i32) {
    %c0_i32 = arith.constant 0 : i32
    %c0_i32_0 = arith.constant 0 : i32
    %c0_i32_1 = arith.constant 0 : i32
    return %c0_i32, %c0_i32_0 : i32, i32
  }
  func.func @transform_7(%arg0: i32) -> (i32, i32) {
    %c0_i32 = arith.constant 0 : i32
    %c0_i32_0 = arith.constant 0 : i32
    %c0_i32_1 = arith.constant 0 : i32
    return %c0_i32, %c0_i32_0 : i32, i32
  }
  func.func @transform_8(%arg0: i32) -> (i32, i32) {
    %c0_i32 = arith.constant 0 : i32
    %c0_i32_0 = arith.constant 0 : i32
    %c0_i32_1 = arith.constant 0 : i32
    return %c0_i32, %c0_i32_0 : i32, i32
  }
  func.func @transform_9(%arg0: i32) -> (i32, i32) {
    %c0_i32 = arith.constant 0 : i32
    %c0_i32_0 = arith.constant 0 : i32
    return %c0_i32, %arg0 : i32, i32
  }
}

</mosaic_0001>

<bundles_post_ra>
// kernel: _nre_mlp_pallas.1
= control target key start
LH: loop header
LB: loop body
LE: loop exit
PB: predicated region body
PF: predicated region fallthrough
CT: control target
= control target key end

     0   :  { %s421_s0 = inlined_call_operand.vmem [shape: bf16[8,4], index: 0, kind: input, shape index: {}]   ;;  %s422_s1 = inlined_call_operand.vmem [shape: bf16[8,8], index: 1, kind: input, shape index: {}]   ;;  %s423_s2 = inlined_call_operand.hbm [shape: bf16[4,64], index: 2, kind: input, shape index: {}]   ;;  %s424_s3 = inlined_call_operand.vmem [shape: bf16[8,64], index: 3, kind: input, shape index: {}]   ;;  %s425_s4 = inlined_call_operand.vmem [shape: f32[1,64], index: 4, kind: input, shape index: {}]   ;;  %s426_s5 = inlined_call_operand.hbm [shape: bf16[64,64], index: 5, kind: input, shape index: {}]   ;;  %s427_s6 = inlined_call_operand.vmem [shape: f32[1,64], index: 6, kind: input, shape index: {}]   ;;  %s428_s7 = inlined_call_operand.vmem [shape: bf16[1,64], index: 7, kind: input, shape index: {}]   ;;  %s429_s8 = inlined_call_operand.<no memory space> [shape: f32[1,1], index: 8, kind: input, shape index: {}]   ;;  %s430_s9 = inlined_call_operand.hbm [shape: f32[1,8], index: 9, kind: output, shape index: {}]  }
   0x1   :  { %v14_v0 = vstv %s429_s8 }
   0x2   :  { %15 = vst [vmem:[#allocation2] sm:$0x1] %v14_v0 }
   0x3   :  { %16 = vsyncpa [#allocation4], 0 }
   0x4   :  { %17 = vsyncpa [#allocation7], 0 }
   0x5   :  { %18 = vsyncpa [#allocation5], 0  ;;  %s28_s13 = sshll.u32 %s423_s2, 4  ;;  %s332_s14 = smov [#allocation3]   ;;  %s29_s13 = int_to_ptr.hbm [resolvable:$true] %s28_s13 }
   0x6   :  { %s30_s15 = sshll.u32 %s332_s14, 4  ;;  %s42_s18 = sshll.u32 %s426_s5, 4  ;;  %s31_s15 = int_to_ptr.vmem [resolvable:$true] %s30_s15  ;;  %s43_s18 = int_to_ptr.hbm [resolvable:$true] %s42_s18 }
   0x7   :  { %33 = dma.hbm_to_vmem [thread:$0]  %s29_s13, 32, %s31_s15, [#allocation4]  }
   0x8   :  { %s333_s19 = smov [#allocation6]   ;;  %s334_s20 = smov 64  }
   0x9   :  { %s44_s8 = sshll.u32 %s333_s19, 4  ;;  %s335_s21 = smov 4   ;;  %s45_s8 = int_to_ptr.vmem [resolvable:$true] %s44_s8 }
   0xa   :  { %50 = dma.hbm_to_vmem [thread:$0]  %s43_s18, 512, %s45_s8, [#allocation7], %s334_s20, %s334_s20, %s335_s21  }
   0xb   :  { %326 = dma.done.wait [#allocation4], 32  }
   0xc   :  { %327 = vsyncadd [#allocation4], 4294967264 }
   0xd   :  { %328 = dma.done.wait [#allocation7], 512  }
   0xe   :  { %329 = vsyncadd [#allocation7], 4294966784  ;;  %vm74_vm0 = vcmask 1043456   ;;  %vm95_vm1 = vcmask 1041408   ;;  %v69_v1 = vld [vmem:[%s424_s3] sm:$0xf] }
   0xf   :  { %v67_v2 = vld [vmem:[#allocation3] sm:$0x3]  ;;  %vm70_vm2 = vcmask 64512   ;;  %v76_v3 = vsel %vm74_vm0, %v69_v1, 0  ;;  %vm91_vm3 = vcmask 31744   ;;  %v243_v8 = vld [vmem:[#allocation6 + $0x10] sm:$0xff] }
  0x10   :  { %v97_v4 = vsel %vm95_vm1, %v67_v2, 0  ;;  %v68_v5 = vld [vmem:[%s422_s1] sm:$0xf]  ;;  %85 = vmatpush.bf16.msra.mxu0 %v76_v3  ;;  %v242_v9 = vld [vmem:[#allocation6 + $0x8] sm:$0xff]  ;;  %vm155_vm4 = vcmask 523264   ;;  %v336_v21 = vmov 0  }
  0x11   :  { %v244_v6 = vld [vmem:[#allocation6 + $0x18] sm:$0xff]  ;;  %106 = vmatpush.bf16.msra.mxu1 %v97_v4  ;;  %v241_v10 = vld [vmem:[#allocation6] sm:$0xff]  ;;  %251 = vset.pattern.permute.xlu0 %v336_v21  ;;  %s337_s28 = smov [#allocation8]   ;;  %s210_s10 = sshll.u32 %s430_s9, 4  ;;  %vm201_vm5 = vcmask 57344   ;;  %s211_s10 = int_to_ptr.hbm [resolvable:$true] %s210_s10 }
  0x12   :  { %v66_v7 = vld [vmem:[%s421_s0] sm:$0xf]  ;;  %163 = vmatpush.bf16.msra.mxu2 %v244_v6  ;;  %s208_s29 = sshll.u32 %s337_s28, 4  ;;  %s209_s29 = int_to_ptr.vmem [resolvable:$true] %s208_s29 }
  0x13   :  { %221 = vmatmul.msk.bf16.vlgmr.msra.gmra.mxu0 %vm70_vm2, %v68_v5  ;;  %v252_v11 = vld [vmem:[%s425_s4] ss:$0 sm:$0xff] }
  0x14   :  { %222 = vmatmul.msk.bf16.vlgmr.msra.gmra.mxu1 %vm91_vm3, %v66_v7  ;;  %v175_v20 = vld [vmem:[#allocation2] sm:$0x1] }
  0x15   :  { %178 = vperm.xlu0 %251, %v175_v20   ;;  %v253_v22 = vld [vmem:[%s427_s6] ss:$0 sm:$0xff] }
  0x16   :  { %164 = vmatpush.bf16.msra.mxu2 %v243_v8  ;;  %v174_v29 = vld [vmem:[%s428_s7] sm:$0x1] }
  0x1a   :  { %165 = vmatpush.bf16.msra.mxu2 %v242_v9 }
  0x1e   :  { %166 = vmatpush.bf16.msra.mxu2 %v241_v10 }
  0x87   :  { %v179_v30 = vpop.permute.xlu0 %178 }
  0x88   :  { %v181_v31 = vperm.slane %v179_v30, 0 }
  0x90   :  { %v87_v12 = vpop.f32.mrf.mxu0 }
  0x91   :  { %v108_v13 = vpop.f32.mrf.mxu1 }
  0x92   :  { %v109_v14 = vadd.f32 %v108_v13, %v87_v12 }
  0x94   :  { %v116_v15 = vadd.f32 %v252_v11, %v109_v14 }
  0x96   :  { %v117_v16 = vmax.f32 %v116_v15, 0.0 }
  0x98   :  { %v118_v17 = vpack.c.bf16 %v117_v16, %v117_v16  ;;  %v89_v18 = vpop.f32.mrf.mxu0 }
  0x99   :  { %v110_v19 = vpop.f32.mrf.mxu1 }
  0x9a   :  { %239 = vmatmul.msk.bf16.vlgmr.msra.gmra.mxu2 %vm155_vm4, %v118_v17 }
 0x11d   :  { %v168_v23 = vpop.f32.mrf.mxu2 }
 0x11e   :  { %v169_v24 = vadd.f32 %v253_v22, %v168_v23 }
 0x120   :  { %v172_v25 = vmax.f32 %v169_v24, 0.0 }
 0x122   :  { %v173_v26 = vpack.c.bf16 %v172_v25, %v172_v25 }
 0x124   :  { %v186_v27 = vsel %vm155_vm4, %v173_v26, 0 }
 0x125   :  { %v170_v28 = vpop.f32.mrf.mxu2  ;;  %195 = vmatpush.bf16.xpose.msra.mxu3 %v186_v27 }
 0x12c   :  { %240 = vmatmul.msk.bf16.vlgmr.msra.gmra.mxu3 %vm155_vm4, %v174_v29 }
 0x1af   :  { %v197_v32 = vpop.f32.mrf.mxu3 }
 0x1b0   :  { %v198_v33 = vadd.f32 %v197_v32, %v181_v31 }
 0x1b2   :  { %202 = vst.msk [vmem:[#allocation8] sm:$0x1] %vm201_vm5, %v198_v33 }
 0x1b3   :  { %213 = dma.vmem_to_hbm [thread:$0]  %s209_s29, 16, %s211_s10, [#allocation5]  }
 0x1b7   :  { %v199_v34 = vpop.f32.mrf.mxu3 }
 0x1b8   :  { %330 = dma.done.wait [#allocation5], 16  }
 0x1b9   :  { %331 = vsyncadd [#allocation5], 4294967280 }
 0x1ba   :  { %218 = vsyncpa [#allocation4], 1 }
 0x1bb   :  { %219 = vsyncpa [#allocation7], 1 }
 0x1bc   :  { %220 = vsyncpa [#allocation5], 1 }

</bundles_post_ra>
